<compile_context>
chip_gen: v7x
topology: tpu7x:2x2x1
jax: 0.10.0
libtpu: 0.0.40
codegen_flags: <defaults>
</compile_context>

<pallas_src>
import functools
import math

import jax
import jax.numpy as jnp
from jax import lax
from jax.experimental import pallas as pl
from jax.experimental.pallas import tpu as pltpu


# ---------------------------------------------------------------------------
# Kernel 1: fused AttentionBranch (QK/V projection + per-head attention)
# ---------------------------------------------------------------------------
def _attn_branch_kernel(x_ref, wq_ref, wk_ref, wv_ref, bias_ref, o_ref,
                        *, num_heads, head_dim, scale):
    # x_ref:    (1, N, D)         tokens for batch b
    # wq_ref:   (1, D, H*hd)      q weight for rank r  (columns = h*hd + d)
    # wk_ref:   (1, D, H*hd)      k weight for rank r
    # wv_ref:   (D, H*hd)         v weight (shared across ranks)
    # bias_ref: (N, N)            additive attention bias (zeros if no mask)
    # o_ref:    (1, 1, N, H*hd)   per-(b, r) output, columns = h*hd + d
    x = x_ref[0].astype(jnp.float32)                    # (N, D)
    wq = wq_ref[0].astype(jnp.float32)                  # (D, H*hd)
    wk = wk_ref[0].astype(jnp.float32)
    wv = wv_ref[...].astype(jnp.float32)
    bias = bias_ref[...].astype(jnp.float32)            # (N, N)

    q_all = jnp.dot(x, wq, preferred_element_type=jnp.float32)   # (N, H*hd)
    k_all = jnp.dot(x, wk, preferred_element_type=jnp.float32)
    v_all = jnp.dot(x, wv, preferred_element_type=jnp.float32)

    for h in range(num_heads):                          # unrolled, H is static
        sl = slice(h * head_dim, (h + 1) * head_dim)
        q = q_all[:, sl]                                # (N, hd)
        k = k_all[:, sl]
        v = v_all[:, sl]
        # logits[n, m] = sum_d q[n, d] * k[m, d]
        logits = lax.dot_general(
            q, k, (((1,), (1,)), ((), ())),
            preferred_element_type=jnp.float32) * scale + bias
        m = jnp.max(logits, axis=-1, keepdims=True)
        e = jnp.exp(logits - m)
        p = e / jnp.sum(e, axis=-1, keepdims=True)
        out_h = jnp.dot(p, v, preferred_element_type=jnp.float32)  # (N, hd)
        o_ref[0, 0, :, sl] = out_h.astype(o_ref.dtype)


def attention_branch(x, w_qk, w_v, *, num_heads, head_dim, rank,
                     attn_bias=None):
    """x: (B, N, D). w_qk: (2*H*R*hd, D) torch layout. w_v: (H*hd, D).

    Returns (B, R, N, H*hd); column index = h*hd + d (heads packed along lanes).
    """
    B, N, D = x.shape
    H, hd, R = num_heads, head_dim, rank
    scale = float(hd) ** -0.5

    # One-time parameter re-layout (torch feature index = ((qk*H+h)*R+r)*hd+d).
    wqk = w_qk.reshape(2, H, R, hd, D)
    wq = jnp.transpose(wqk[0], (1, 0, 2, 3)).reshape(R, H * hd, D)
    wq = jnp.transpose(wq, (0, 2, 1))                    # (R, D, H*hd)
    wk = jnp.transpose(wqk[1], (1, 0, 2, 3)).reshape(R, H * hd, D)
    wk = jnp.transpose(wk, (0, 2, 1))                    # (R, D, H*hd)
    wv = w_v.T                                           # (D, H*hd)

    if attn_bias is None:
        attn_bias = jnp.zeros((N, N), jnp.float32)
    attn_bias = attn_bias.astype(jnp.float32)

    kernel = functools.partial(_attn_branch_kernel, num_heads=H,
                               head_dim=hd, scale=scale)
    return pl.pallas_call(
        kernel,
        out_shape=jax.ShapeDtypeStruct((B, R, N, H * hd), x.dtype),
        grid_spec=pltpu.PrefetchScalarGridSpec(
            num_scalar_prefetch=0,
            grid=(B, R),
            in_specs=[
                pl.BlockSpec((1, N, D), lambda b, r: (b, 0, 0)),      # tokens
                pl.BlockSpec((1, D, H * hd), lambda b, r: (r, 0, 0)),  # Wq[r]
                pl.BlockSpec((1, D, H * hd), lambda b, r: (r, 0, 0)),  # Wk[r]
                pl.BlockSpec((D, H * hd), lambda b, r: (0, 0)),        # Wv
                pl.BlockSpec((N, N), lambda b, r: (0, 0)),             # bias
            ],
            out_specs=pl.BlockSpec((1, 1, N, H * hd),
                                   lambda b, r: (b, r, 0, 0)),
        ),
        compiler_params=pltpu.CompilerParams(
            dimension_semantics=("parallel", "parallel"),
        ),
    )(x, wq, wk, wv, attn_bias)


# ---------------------------------------------------------------------------
# Kernel 2: low-rank outer-product combine + rank-sum + output projection
# ---------------------------------------------------------------------------
def _combine_proj_kernel(xc_ref, xs_ref, w_ref, b_ref, o_ref,
                         *, rank, num_heads, c_hd, s_hd, n_c):
    # xc_ref: (1, R, C,  H*c_hd)   channel-branch output (cols = h*c_hd + ai)
    # xs_ref: (1, R, HW, H*s_hd)   spatial-branch output (cols = h*s_hd + bi)
    # w_ref:  (H, c_hd, s_hd, dim) proj weight.T reshaped per head/position
    # b_ref:  (1, dim)             proj bias
    # o_ref:  (1, C, HW, dim)
    hw = xs_ref.shape[2]
    dim = w_ref.shape[-1]

    accs = [jnp.zeros((hw, dim), jnp.float32) for _ in range(n_c)]
    for r in range(rank):
        xcb = xc_ref[0, r].astype(jnp.float32)           # (C, H*c_hd)
        xsb = xs_ref[0, r].astype(jnp.float32)           # (HW, H*s_hd)
        for h in range(num_heads):
            s = xsb[:, h * s_hd:(h + 1) * s_hd]          # (HW, s_hd)
            for ai in range(c_hd):
                w_slice = w_ref[h, ai].astype(jnp.float32)       # (s_hd, dim)
                p = jnp.dot(s, w_slice,
                            preferred_element_type=jnp.float32)  # (HW, dim)
                col = h * c_hd + ai
                for c in range(n_c):
                    coef = xcb[c:c + 1, col:col + 1]             # (1, 1)
                    accs[c] = accs[c] + coef * p
    bias = b_ref[...].astype(jnp.float32)                        # (1, dim)
    for c in range(n_c):
        o_ref[0, c] = (accs[c] + bias).astype(o_ref.dtype)


def combine_and_project(xc, xs, w_proj, b_proj, *, num_heads, c_hd, s_hd):
    """xc: (B, R, C, H*c_hd); xs: (B, R, HW, H*s_hd).

    w_proj: (dim, dim) torch layout (out, in); b_proj: (dim,).
    Returns (B, C, HW, dim)."""
    B, R, C, _ = xc.shape
    HW = xs.shape[2]
    H = num_heads
    dim = w_proj.shape[0]

    # proj input-feature index = h*(c_hd*s_hd) + ai*s_hd + bi
    w_r = w_proj.T.reshape(H, c_hd, s_hd, dim)           # one-time re-layout
    b2 = b_proj.reshape(1, dim)

    kernel = functools.partial(_combine_proj_kernel, rank=R, num_heads=H,
                               c_hd=c_hd, s_hd=s_hd, n_c=C)
    return pl.pallas_call(
        kernel,
        out_shape=jax.ShapeDtypeStruct((B, C, HW, dim), xc.dtype),
        grid_spec=pltpu.PrefetchScalarGridSpec(
            num_scalar_prefetch=0,
            grid=(B,),
            in_specs=[
                pl.BlockSpec((1, R, C, H * c_hd), lambda b: (b, 0, 0, 0)),
                pl.BlockSpec((1, R, HW, H * s_hd), lambda b: (b, 0, 0, 0)),
                pl.BlockSpec((H, c_hd, s_hd, dim), lambda b: (0, 0, 0, 0)),
                pl.BlockSpec((1, dim), lambda b: (0, 0)),
            ],
            out_specs=pl.BlockSpec((1, C, HW, dim), lambda b: (b, 0, 0, 0)),
        ),
        compiler_params=pltpu.CompilerParams(
            dimension_semantics=("parallel",),
        ),
    )(xc, xs, w_r, b2)


# ---------------------------------------------------------------------------
# Top-level forward
# ---------------------------------------------------------------------------
def low_rank_attention(x_c, x_s, params, *, num_heads, rank,
                       spatial_mask=None):
    B, C, channel_dim = x_c.shape
    HW = x_s.shape[1]
    spatial_dim = x_s.shape[2]
    c_hd = channel_dim // num_heads
    s_hd = spatial_dim // num_heads

    xc = attention_branch(x_c, params["w_qk_c"], params["w_v_c"],
                          num_heads=num_heads, head_dim=c_hd, rank=rank)

    s_bias = None
    if spatial_mask is not None:
        s_bias = jnp.where(spatial_mask == 0, -jnp.inf, 0.0)
    xs = attention_branch(x_s, params["w_qk_s"], params["w_v_s"],
                          num_heads=num_heads, head_dim=s_hd, rank=rank,
                          attn_bias=s_bias)

    return combine_and_project(xc, xs, params["w_proj"], params["b_proj"],
                               num_heads=num_heads, c_hd=c_hd, s_hd=s_hd)


# ---------------------------------------------------------------------------
# Pure-JAX reference (mirrors the PyTorch forward exactly)
# ---------------------------------------------------------------------------
def _attn_branch_ref(x, w_qk, w_v, num_heads, head_dim, rank, attn_bias=None):
    B, N, D = x.shape
    H, hd, R = num_heads, head_dim, rank
    v = (x @ w_v.T).reshape(B, N, H, hd).transpose(0, 2, 1, 3)       # (B,H,N,hd)
    qk = (x @ w_qk.T).reshape(B, N, 2, H, R, hd).transpose(2, 0, 4, 3, 1, 5)
    q, k = qk[0], qk[1]                                              # (B,R,H,N,hd)
    scale = hd ** -0.5
    attn = jnp.einsum("brhnd,brhmd->brhnm", q, k) * scale
    if attn_bias is not None:
        attn = attn + attn_bias
    attn = jax.nn.softmax(attn, axis=-1)
    v = jnp.broadcast_to(v[:, None], (B, R, H, N, hd))
    return jnp.einsum("brhnm,brhmd->brhnd", attn, v)                 # (B,R,H,N,hd)


def _low_rank_attention_ref(x_c, x_s, params, num_heads, rank,
                            spatial_mask=None):
    B, C, channel_dim = x_c.shape
    HW, spatial_dim = x_s.shape[1], x_s.shape[2]
    c_hd = channel_dim // num_heads
    s_hd = spatial_dim // num_heads
    head_dim = c_hd * s_hd
    dim = num_heads * head_dim
    bias = None
    if spatial_mask is not None:
        bias = jnp.where(spatial_mask == 0, -jnp.inf, 0.0)
    xc = _attn_branch_ref(x_c, params["w_qk_c"], params["w_v_c"],
                          num_heads, c_hd, rank)
    xs = _attn_branch_ref(x_s, params["w_qk_s"], params["w_v_s"],
                          num_heads, s_hd, rank, bias)
    t = jnp.einsum("...ca,...nb->...cnab", xc, xs)
    t = t.reshape(B, rank, num_heads, C, HW, head_dim)
    t = t.sum(axis=1)                                    # (B,H,C,HW,head_dim)
    t = jnp.transpose(t, (0, 2, 3, 1, 4)).reshape(B, C, HW, dim)
    return t @ params["w_proj"].T + params["b_proj"]


# ---------------------------------------------------------------------------
# Parameter init (mirrors nn.Linear defaults, deterministic)
# ---------------------------------------------------------------------------
def _init_params(key, dim, channel_dim, spatial_dim, num_heads, rank,
                 dtype=jnp.float32):
    c_hd = channel_dim // num_heads
    s_hd = spatial_dim // num_heads
    keys = jax.random.split(key, 6)

    def lin_w(k, out_f, in_f):
        bound = 1.0 / math.sqrt(in_f)
        return jax.random.uniform(k, (out_f, in_f), dtype, -bound, bound)

    return dict(
        w_qk_c=lin_w(keys[0], 2 * num_heads * rank * c_hd, channel_dim),
        w_v_c=lin_w(keys[1], num_heads * c_hd, channel_dim),
        w_qk_s=lin_w(keys[2], 2 * num_heads * rank * s_hd, spatial_dim),
        w_v_s=lin_w(keys[3], num_heads * s_hd, spatial_dim),
        w_proj=lin_w(keys[4], dim, dim),
        b_proj=jax.random.uniform(keys[5], (dim,), dtype,
                                  -1.0 / math.sqrt(dim), 1.0 / math.sqrt(dim)),
    )


if __name__ == "__main__":
    key = jax.random.PRNGKey(0)
    k_xc, k_xs, k_p = jax.random.split(key, 3)

    # Small shapes consistent with the module constraints:
    #   channel_dim % H == 0, spatial_dim % H == 0,
    #   head_dim = dim // H = c_head_dim * s_head_dim
    B = 2
    num_heads = 4
    rank = 2
    C = 4                # number of channel tokens
    HW = 16              # number of spatial tokens
    channel_dim = 16     # c_head_dim = 4
    spatial_dim = 8      # s_head_dim = 2
    c_hd = channel_dim // num_heads
    s_hd = spatial_dim // num_heads
    dim = num_heads * c_hd * s_hd   # 32

    x_c = jax.random.normal(k_xc, (B, C, channel_dim), jnp.float32)
    x_s = jax.random.normal(k_xs, (B, HW, spatial_dim), jnp.float32)
    params = _init_params(k_p, dim, channel_dim, spatial_dim, num_heads, rank)

    out = low_rank_attention(x_c, x_s, params, num_heads=num_heads, rank=rank,
                             spatial_mask=None)
    out = jax.block_until_ready(out)

    ref = _low_rank_attention_ref(x_c, x_s, params, num_heads, rank, None)
    assert out.shape == (B, C, HW, dim), out.shape
    max_err = float(jnp.max(jnp.abs(out - ref)))
    assert jnp.allclose(out, ref, atol=1e-4, rtol=1e-4), f"max err {max_err}"

    print("KERNEL_OK")
</pallas_src>

<mosaic_0001>
module attributes {stable_mosaic.version = 11 : i64} {
  func.func @_attn_branch_kernel(%arg0: i32, %arg1: i32, %arg2: memref<1x4x16xf32, #tpu.memory_space<vmem>>, %arg3: memref<1x16x16xf32, #tpu.memory_space<vmem>>, %arg4: memref<1x16x16xf32, #tpu.memory_space<vmem>>, %arg5: memref<16x16xf32, #tpu.memory_space<vmem>>, %arg6: memref<4x4xf32, #tpu.memory_space<vmem>>, %arg7: memref<1x1x4x16xf32, #tpu.memory_space<vmem>>) attributes {dimension_semantics = [#tpu.dimension_semantics<parallel>, #tpu.dimension_semantics<parallel>], iteration_bounds = array<i64: 2, 2>, scalar_prefetch = 0 : i64, scratch_operands = 0 : i64, tpu.core_type = #tpu.core_type<tc>, window_params = [{transform_indices = @transform_0, window_bounds = array<i64: 1, 4, 16>}, {transform_indices = @transform_1, window_bounds = array<i64: 1, 16, 16>}, {transform_indices = @transform_2, window_bounds = array<i64: 1, 16, 16>}, {pipeline_mode = #tpu.pipeline_mode<synchronous>, transform_indices = @transform_3, window_bounds = array<i64: 16, 16>}, {pipeline_mode = #tpu.pipeline_mode<synchronous>, transform_indices = @transform_4, window_bounds = array<i64: 4, 4>}, {transform_indices = @transform_5, window_bounds = array<i64: 1, 1, 4, 16>}]} {
    %c0 = arith.constant 0 : index
    %c0_0 = arith.constant 0 : index
    %c0_1 = arith.constant 0 : index
    %0 = vector.load %arg2[%c0, %c0_0, %c0_1] : memref<1x4x16xf32, #tpu.memory_space<vmem>>, vector<1x4x16xf32>
    %1 = vector.shape_cast %0 : vector<1x4x16xf32> to vector<4x16xf32>
    %c0_2 = arith.constant 0 : index
    %c0_3 = arith.constant 0 : index
    %c0_4 = arith.constant 0 : index
    %2 = vector.load %arg3[%c0_2, %c0_3, %c0_4] : memref<1x16x16xf32, #tpu.memory_space<vmem>>, vector<1x16x16xf32>
    %3 = vector.shape_cast %2 : vector<1x16x16xf32> to vector<16x16xf32>
    %c0_5 = arith.constant 0 : index
    %c0_6 = arith.constant 0 : index
    %c0_7 = arith.constant 0 : index
    %4 = vector.load %arg4[%c0_5, %c0_6, %c0_7] : memref<1x16x16xf32, #tpu.memory_space<vmem>>, vector<1x16x16xf32>
    %5 = vector.shape_cast %4 : vector<1x16x16xf32> to vector<16x16xf32>
    %c0_8 = arith.constant 0 : index
    %c0_9 = arith.constant 0 : index
    %6 = vector.load %arg5[%c0_8, %c0_9] : memref<16x16xf32, #tpu.memory_space<vmem>>, vector<16x16xf32>
    %c0_10 = arith.constant 0 : index
    %c0_11 = arith.constant 0 : index
    %7 = vector.load %arg6[%c0_10, %c0_11] : memref<4x4xf32, #tpu.memory_space<vmem>>, vector<4x4xf32>
    %cst = arith.constant dense<0.000000e+00> : vector<4x16xf32>
    %8 = tpu.matmul %1, %3, %cst {dimension_numbers = #tpu.dot_dimension_numbers<[1], [0], [0], [1], [0, 0, 1, 1], [], []>} : vector<4x16xf32>, vector<16x16xf32>, vector<4x16xf32> -> vector<4x16xf32>
    %cst_12 = arith.constant dense<0.000000e+00> : vector<4x16xf32>
    %9 = tpu.matmul %1, %5, %cst_12 {dimension_numbers = #tpu.dot_dimension_numbers<[1], [0], [0], [1], [0, 0, 1, 1], [], []>} : vector<4x16xf32>, vector<16x16xf32>, vector<4x16xf32> -> vector<4x16xf32>
    %cst_13 = arith.constant dense<0.000000e+00> : vector<4x16xf32>
    %10 = tpu.matmul %1, %6, %cst_13 {dimension_numbers = #tpu.dot_dimension_numbers<[1], [0], [0], [1], [0, 0, 1, 1], [], []>} : vector<4x16xf32>, vector<16x16xf32>, vector<4x16xf32> -> vector<4x16xf32>
    %11 = vector.extract_strided_slice %8 {offsets = [0, 0], sizes = [4, 4], strides = [1, 1]} : vector<4x16xf32> to vector<4x4xf32>
    %12 = vector.extract_strided_slice %9 {offsets = [0, 0], sizes = [4, 4], strides = [1, 1]} : vector<4x16xf32> to vector<4x4xf32>
    %13 = vector.extract_strided_slice %10 {offsets = [0, 0], sizes = [4, 4], strides = [1, 1]} : vector<4x16xf32> to vector<4x4xf32>
    %cst_14 = arith.constant dense<0.000000e+00> : vector<4x4xf32>
    %14 = tpu.matmul %11, %12, %cst_14 {dimension_numbers = #tpu.dot_dimension_numbers<[1], [1], [0], [0], [0, 0, 1, 0], [], []>} : vector<4x4xf32>, vector<4x4xf32>, vector<4x4xf32> -> vector<4x4xf32>
    %cst_15 = arith.constant 5.000000e-01 : f32
    %15 = vector.broadcast %cst_15 : f32 to vector<4x4xf32>
    %16 = arith.mulf %14, %15 : vector<4x4xf32>
    %17 = arith.addf %16, %7 : vector<4x4xf32>
    %cst_16 = arith.constant dense<0xFF800000> : vector<4xf32>
    %18 = vector.multi_reduction <maximumf>, %17, %cst_16 [1] : vector<4x4xf32> to vector<4xf32>
    %19 = vector.shape_cast %18 : vector<4xf32> to vector<4x1xf32>
    %20 = vector.broadcast %19 : vector<4x1xf32> to vector<4x4xf32>
    %21 = arith.subf %17, %20 : vector<4x4xf32>
    %22 = math.exp %21 : vector<4x4xf32>
    %cst_17 = arith.constant dense<0.000000e+00> : vector<4xf32>
    %23 = vector.multi_reduction <add>, %22, %cst_17 [1] : vector<4x4xf32> to vector<4xf32>
    %24 = vector.shape_cast %23 : vector<4xf32> to vector<4x1xf32>
    %25 = vector.broadcast %24 : vector<4x1xf32> to vector<4x4xf32>
    %26 = arith.divf %22, %25 : vector<4x4xf32>
    %cst_18 = arith.constant dense<0.000000e+00> : vector<4x4xf32>
    %27 = tpu.matmul %26, %13, %cst_18 {dimension_numbers = #tpu.dot_dimension_numbers<[1], [0], [0], [1], [0, 0, 1, 1], [], []>} : vector<4x4xf32>, vector<4x4xf32>, vector<4x4xf32> -> vector<4x4xf32>
    %c0_19 = arith.constant 0 : index
    %c0_20 = arith.constant 0 : index
    %c0_21 = arith.constant 0 : index
    %c0_22 = arith.constant 0 : index
    %28 = vector.load %arg7[%c0_19, %c0_20, %c0_21, %c0_22] : memref<1x1x4x16xf32, #tpu.memory_space<vmem>>, vector<1x1x4x4xf32>
    %29 = vector.shape_cast %28 : vector<1x1x4x4xf32> to vector<4x4xf32>
    %30 = vector.shape_cast %27 : vector<4x4xf32> to vector<1x1x4x4xf32>
    tpu.vector_store %arg7[%c0_19, %c0_20, %c0_21, %c0_22], %30 {strides = array<i32>} : memref<1x1x4x16xf32, #tpu.memory_space<vmem>>, vector<1x1x4x4xf32>,
    %31 = vector.extract_strided_slice %8 {offsets = [0, 4], sizes = [4, 4], strides = [1, 1]} : vector<4x16xf32> to vector<4x4xf32>
    %32 = vector.extract_strided_slice %9 {offsets = [0, 4], sizes = [4, 4], strides = [1, 1]} : vector<4x16xf32> to vector<4x4xf32>
    %33 = vector.extract_strided_slice %10 {offsets = [0, 4], sizes = [4, 4], strides = [1, 1]} : vector<4x16xf32> to vector<4x4xf32>
    %cst_23 = arith.constant dense<0.000000e+00> : vector<4x4xf32>
    %34 = tpu.matmul %31, %32, %cst_23 {dimension_numbers = #tpu.dot_dimension_numbers<[1], [1], [0], [0], [0, 0, 1, 0], [], []>} : vector<4x4xf32>, vector<4x4xf32>, vector<4x4xf32> -> vector<4x4xf32>
    %cst_24 = arith.constant 5.000000e-01 : f32
    %35 = vector.broadcast %cst_24 : f32 to vector<4x4xf32>
    %36 = arith.mulf %34, %35 : vector<4x4xf32>
    %37 = arith.addf %36, %7 : vector<4x4xf32>
    %cst_25 = arith.constant dense<0xFF800000> : vector<4xf32>
    %38 = vector.multi_reduction <maximumf>, %37, %cst_25 [1] : vector<4x4xf32> to vector<4xf32>
    %39 = vector.shape_cast %38 : vector<4xf32> to vector<4x1xf32>
    %40 = vector.broadcast %39 : vector<4x1xf32> to vector<4x4xf32>
    %41 = arith.subf %37, %40 : vector<4x4xf32>
    %42 = math.exp %41 : vector<4x4xf32>
    %cst_26 = arith.constant dense<0.000000e+00> : vector<4xf32>
    %43 = vector.multi_reduction <add>, %42, %cst_26 [1] : vector<4x4xf32> to vector<4xf32>
    %44 = vector.shape_cast %43 : vector<4xf32> to vector<4x1xf32>
    %45 = vector.broadcast %44 : vector<4x1xf32> to vector<4x4xf32>
    %46 = arith.divf %42, %45 : vector<4x4xf32>
    %cst_27 = arith.constant dense<0.000000e+00> : vector<4x4xf32>
    %47 = tpu.matmul %46, %33, %cst_27 {dimension_numbers = #tpu.dot_dimension_numbers<[1], [0], [0], [1], [0, 0, 1, 1], [], []>} : vector<4x4xf32>, vector<4x4xf32>, vector<4x4xf32> -> vector<4x4xf32>
    %c0_28 = arith.constant 0 : index
    %c0_29 = arith.constant 0 : index
    %c0_30 = arith.constant 0 : index
    %c4 = arith.constant 4 : index
    %48 = vector.load %arg7[%c0_28, %c0_29, %c0_30, %c4] : memref<1x1x4x16xf32, #tpu.memory_space<vmem>>, vector<1x1x4x4xf32>
    %49 = vector.shape_cast %48 : vector<1x1x4x4xf32> to vector<4x4xf32>
    %50 = vector.shape_cast %47 : vector<4x4xf32> to vector<1x1x4x4xf32>
    tpu.vector_store %arg7[%c0_28, %c0_29, %c0_30, %c4], %50 {strides = array<i32>} : memref<1x1x4x16xf32, #tpu.memory_space<vmem>>, vector<1x1x4x4xf32>,
    %51 = vector.extract_strided_slice %8 {offsets = [0, 8], sizes = [4, 4], strides = [1, 1]} : vector<4x16xf32> to vector<4x4xf32>
    %52 = vector.extract_strided_slice %9 {offsets = [0, 8], sizes = [4, 4], strides = [1, 1]} : vector<4x16xf32> to vector<4x4xf32>
    %53 = vector.extract_strided_slice %10 {offsets = [0, 8], sizes = [4, 4], strides = [1, 1]} : vector<4x16xf32> to vector<4x4xf32>
    %cst_31 = arith.constant dense<0.000000e+00> : vector<4x4xf32>
    %54 = tpu.matmul %51, %52, %cst_31 {dimension_numbers = #tpu.dot_dimension_numbers<[1], [1], [0], [0], [0, 0, 1, 0], [], []>} : vector<4x4xf32>, vector<4x4xf32>, vector<4x4xf32> -> vector<4x4xf32>
    %cst_32 = arith.constant 5.000000e-01 : f32
    %55 = vector.broadcast %cst_32 : f32 to vector<4x4xf32>
    %56 = arith.mulf %54, %55 : vector<4x4xf32>
    %57 = arith.addf %56, %7 : vector<4x4xf32>
    %cst_33 = arith.constant dense<0xFF800000> : vector<4xf32>
    %58 = vector.multi_reduction <maximumf>, %57, %cst_33 [1] : vector<4x4xf32> to vector<4xf32>
    %59 = vector.shape_cast %58 : vector<4xf32> to vector<4x1xf32>
    %60 = vector.broadcast %59 : vector<4x1xf32> to vector<4x4xf32>
    %61 = arith.subf %57, %60 : vector<4x4xf32>
    %62 = math.exp %61 : vector<4x4xf32>
    %cst_34 = arith.constant dense<0.000000e+00> : vector<4xf32>
    %63 = vector.multi_reduction <add>, %62, %cst_34 [1] : vector<4x4xf32> to vector<4xf32>
    %64 = vector.shape_cast %63 : vector<4xf32> to vector<4x1xf32>
    %65 = vector.broadcast %64 : vector<4x1xf32> to vector<4x4xf32>
    %66 = arith.divf %62, %65 : vector<4x4xf32>
    %cst_35 = arith.constant dense<0.000000e+00> : vector<4x4xf32>
    %67 = tpu.matmul %66, %53, %cst_35 {dimension_numbers = #tpu.dot_dimension_numbers<[1], [0], [0], [1], [0, 0, 1, 1], [], []>} : vector<4x4xf32>, vector<4x4xf32>, vector<4x4xf32> -> vector<4x4xf32>
    %c0_36 = arith.constant 0 : index
    %c0_37 = arith.constant 0 : index
    %c0_38 = arith.constant 0 : index
    %c8 = arith.constant 8 : index
    %68 = vector.load %arg7[%c0_36, %c0_37, %c0_38, %c8] : memref<1x1x4x16xf32, #tpu.memory_space<vmem>>, vector<1x1x4x4xf32>
    %69 = vector.shape_cast %68 : vector<1x1x4x4xf32> to vector<4x4xf32>
    %70 = vector.shape_cast %67 : vector<4x4xf32> to vector<1x1x4x4xf32>
    tpu.vector_store %arg7[%c0_36, %c0_37, %c0_38, %c8], %70 {strides = array<i32>} : memref<1x1x4x16xf32, #tpu.memory_space<vmem>>, vector<1x1x4x4xf32>,
    %71 = vector.extract_strided_slice %8 {offsets = [0, 12], sizes = [4, 4], strides = [1, 1]} : vector<4x16xf32> to vector<4x4xf32>
    %72 = vector.extract_strided_slice %9 {offsets = [0, 12], sizes = [4, 4], strides = [1, 1]} : vector<4x16xf32> to vector<4x4xf32>
    %73 = vector.extract_strided_slice %10 {offsets = [0, 12], sizes = [4, 4], strides = [1, 1]} : vector<4x16xf32> to vector<4x4xf32>
    %cst_39 = arith.constant dense<0.000000e+00> : vector<4x4xf32>
    %74 = tpu.matmul %71, %72, %cst_39 {dimension_numbers = #tpu.dot_dimension_numbers<[1], [1], [0], [0], [0, 0, 1, 0], [], []>} : vector<4x4xf32>, vector<4x4xf32>, vector<4x4xf32> -> vector<4x4xf32>
    %cst_40 = arith.constant 5.000000e-01 : f32
    %75 = vector.broadcast %cst_40 : f32 to vector<4x4xf32>
    %76 = arith.mulf %74, %75 : vector<4x4xf32>
    %77 = arith.addf %76, %7 : vector<4x4xf32>
    %cst_41 = arith.constant dense<0xFF800000> : vector<4xf32>
    %78 = vector.multi_reduction <maximumf>, %77, %cst_41 [1] : vector<4x4xf32> to vector<4xf32>
    %79 = vector.shape_cast %78 : vector<4xf32> to vector<4x1xf32>
    %80 = vector.broadcast %79 : vector<4x1xf32> to vector<4x4xf32>
    %81 = arith.subf %77, %80 : vector<4x4xf32>
    %82 = math.exp %81 : vector<4x4xf32>
    %cst_42 = arith.constant dense<0.000000e+00> : vector<4xf32>
    %83 = vector.multi_reduction <add>, %82, %cst_42 [1] : vector<4x4xf32> to vector<4xf32>
    %84 = vector.shape_cast %83 : vector<4xf32> to vector<4x1xf32>
    %85 = vector.broadcast %84 : vector<4x1xf32> to vector<4x4xf32>
    %86 = arith.divf %82, %85 : vector<4x4xf32>
    %cst_43 = arith.constant dense<0.000000e+00> : vector<4x4xf32>
    %87 = tpu.matmul %86, %73, %cst_43 {dimension_numbers = #tpu.dot_dimension_numbers<[1], [0], [0], [1], [0, 0, 1, 1], [], []>} : vector<4x4xf32>, vector<4x4xf32>, vector<4x4xf32> -> vector<4x4xf32>
    %c0_44 = arith.constant 0 : index
    %c0_45 = arith.constant 0 : index
    %c0_46 = arith.constant 0 : index
    %c12 = arith.constant 12 : index
    %88 = vector.load %arg7[%c0_44, %c0_45, %c0_46, %c12] : memref<1x1x4x16xf32, #tpu.memory_space<vmem>>, vector<1x1x4x4xf32>
    %89 = vector.shape_cast %88 : vector<1x1x4x4xf32> to vector<4x4xf32>
    %90 = vector.shape_cast %87 : vector<4x4xf32> to vector<1x1x4x4xf32>
    tpu.vector_store %arg7[%c0_44, %c0_45, %c0_46, %c12], %90 {strides = array<i32>} : memref<1x1x4x16xf32, #tpu.memory_space<vmem>>, vector<1x1x4x4xf32>,
    return
  }
  func.func @transform_0(%arg0: i32, %arg1: i32) -> (i32, i32, i32) {
    %c0_i32 = arith.constant 0 : i32
    %c0_i32_0 = arith.constant 0 : i32
    %c0_i32_1 = arith.constant 0 : i32
    return %arg0, %c0_i32, %c0_i32_0 : i32, i32, i32
  }
  func.func @transform_1(%arg0: i32, %arg1: i32) -> (i32, i32, i32) {
    %c0_i32 = arith.constant 0 : i32
    %c0_i32_0 = arith.constant 0 : i32
    %c0_i32_1 = arith.constant 0 : i32
    return %arg1, %c0_i32, %c0_i32_0 : i32, i32, i32
  }
  func.func @transform_2(%arg0: i32, %arg1: i32) -> (i32, i32, i32) {
    %c0_i32 = arith.constant 0 : i32
    %c0_i32_0 = arith.constant 0 : i32
    %c0_i32_1 = arith.constant 0 : i32
    return %arg1, %c0_i32, %c0_i32_0 : i32, i32, i32
  }
  func.func @transform_3(%arg0: i32, %arg1: i32) -> (i32, i32) {
    %c0_i32 = arith.constant 0 : i32
    %c0_i32_0 = arith.constant 0 : i32
    %c0_i32_1 = arith.constant 0 : i32
    return %c0_i32, %c0_i32_0 : i32, i32
  }
  func.func @transform_4(%arg0: i32, %arg1: i32) -> (i32, i32) {
    %c0_i32 = arith.constant 0 : i32
    %c0_i32_0 = arith.constant 0 : i32
    %c0_i32_1 = arith.constant 0 : i32
    return %c0_i32, %c0_i32_0 : i32, i32
  }
  func.func @transform_5(%arg0: i32, %arg1: i32) -> (i32, i32, i32, i32) {
    %c0_i32 = arith.constant 0 : i32
    %c0_i32_0 = arith.constant 0 : i32
    %c0_i32_1 = arith.constant 0 : i32
    return %arg0, %arg1, %c0_i32, %c0_i32_0 : i32, i32, i32, i32
  }
}

</mosaic_0001>

<bundles_post_ra>
// kernel: tpu_custom_call.1
= control target key start
LH: loop header
LB: loop body
LE: loop exit
PB: predicated region body
PF: predicated region fallthrough
CT: control target
= control target key end

     0   :  { %s2536_s0 = inlined_call_operand.hbm [shape: f32[2,4,16], index: 0, kind: input, shape index: {}]   ;;  %s2537_s1 = inlined_call_operand.hbm [shape: f32[2,16,16], index: 1, kind: input, shape index: {}]   ;;  %s2538_s2 = inlined_call_operand.hbm [shape: f32[2,16,16], index: 2, kind: input, shape index: {}]   ;;  %s2539_s3 = inlined_call_operand.hbm [shape: f32[16,16], index: 3, kind: input, shape index: {}]   ;;  %s2540_s4 = inlined_call_operand.vmem [shape: f32[4,4], index: 4, kind: input, shape index: {}]   ;;  %s2541_s5 = inlined_call_operand.hbm [shape: f32[2,2,4,16], index: 5, kind: output, shape index: {}]  }
   0x1   :  { %2575 = sst [smem:[#allocation28_spill]] %s2536_s0 }
   0x2   :  { %2576 = sst [smem:[#allocation29_spill]] %s2537_s1 }
   0x3   :  { %2577 = sst [smem:[#allocation30_spill]] %s2539_s3 }
   0x4   :  { %2578 = sst [smem:[#allocation31_spill]] %s2540_s4 }
   0x5   :  { %2579 = sst [smem:[#allocation32_spill]] %s2541_s5 }
   0x6   :  { %10 = vsyncpa [#allocation3], 0 }
   0x7   :  { %12 = vsyncpa [#allocation3 + $0x1], 0 }
   0x8   :  { %13 = vsyncpa [#allocation6], 0 }
   0x9   :  { %15 = vsyncpa [#allocation6 + $0x1], 0 }
   0xa   :  { %16 = vsyncpa [#allocation9], 0 }
   0xb   :  { %17 = vsyncpa [#allocation4], 0 }
   0xc   :  { %19 = vsyncpa [#allocation4 + $0x1], 0  ;;  %s2045_s18 = smov 0   ;;  %s2047_s19 = smov 0  }
   0xd   :  { %s2049_s20 = smov 0   ;;  %s2051_s21 = smov 0  }
   0xe   :  { %s2053_s22 = smov 0   ;;  %s2055_s23 = smov 0  }
   0xf   :  { %s2057_s24 = smov 0   ;;  %s2059_s25 = smov 0  }
  0x10   :  { %s2061_s26 = smov 0   ;;  %s2063_s27 = smov 0  }
  0x11   :  { %s2065_s28 = smov 0   ;;  %s2067_s29 = smov 0  }
  0x12   :  { %s2069_s30 = smov 0   ;;  %s2071_s6 = smov 0  }
  0x13 LB: > { %2580 = sst [smem:[#allocation15_spill]] %s1945_s18  ;;  %s34_s7 = sadd.s32 1, %s1989_s29  ;;  %s1997_s6 = sphi %s2071_s6, %s25_s6   ;;  %s1993_s30 = sphi %s2069_s30, %s2650_s30   ;;  %s1989_s29 = sphi %s2067_s29, %s2642_s29   ;;  %s1985_s28 = sphi %s2065_s28, %s2649_s28   ;;  %s1981_s27 = sphi %s2063_s27, %s2641_s27   ;;  %s1977_s26 = sphi %s2061_s26, %s2648_s26   ;;  %s1973_s25 = sphi %s2059_s25, %s2647_s25   ;;  %s1969_s24 = sphi %s2057_s24, %s2646_s24   ;;  %s1965_s23 = sphi %s2055_s23, %s2645_s23   ;;  %s1961_s22 = sphi %s2053_s22, %s2640_s22   ;;  %s1957_s21 = sphi %s2051_s21, %s2639_s21   ;;  %s1953_s20 = sphi %s2049_s20, %s2644_s20   ;;  %s1949_s19 = sphi %s2047_s19, %s2643_s19   ;;  %s1945_s18 = sphi %s2045_s18, %s2637_s18  }
  0x14   : > { %2581 = sst [smem:[#allocation16_spill]] %s1949_s19  ;;  %p2548_p0 = scmp.eq.s32.totalorder %s1997_s6, 0 }
  0x15   : > { %2582 = sst [smem:[#allocation17_spill]] %s1961_s22  ;;  %p2117_p1 = scmp.ge.s32.totalorder %s34_s7, 2 }
  0x16   : > { %2583 = sst [smem:[#allocation18_spill]] %s1965_s23  ;;  %p77_p2 = scmp.ne.s32.totalorder %s1965_s23, %s1961_s22 }
  0x17   : > { %2584 = sst [smem:[#allocation19_spill]] %s1981_s27  ;;  %s2652_s7 = smov (%p2117_p1, %s34_s7), 0 }
  0x18   : > { %2585 = sst [smem:[#allocation20_spill]] %s1985_s28  ;;  %p79_p3 = por %p77_p2, %p2548_p0 }
  0x19   : > { %2586 = sst [smem:[#allocation21_spill]] %s1989_s29  ;;  %p2547_p4 = scmp.lt.s32.totalorder %s1997_s6, 4 }
  0x1a   : > { %s2587_s8 = scalar_select %p2117_p1, 1, 0 }
  0x1b   : > { %2588 = sst [smem:[#allocation22_spill]] %s2652_s7  ;;  %s237_s9 = sand.u32 1, %s1997_s6  }
  0x1c   : > { %s239_s10 = sand.u32 1, %s1965_s23   ;;  %s1454_s12 = sshll.u32 %s1989_s29, 8 }
  0x1d   : > { %s2132_s11 = sshll.u32 %s239_s10, 4  ;;  %s2589_s1 = sld [smem:[#allocation29_spill]] }
  0x1e   : > { %s241_s16 = scalar_lea.vmem [#allocation5], %s2132_s11  ;;  %p2145_p5 = pnand %p2547_p4, %p79_p3 }
  0x1f   : > { %s248_s17 = sshll.u32 %s241_s16, 4  ;;  %s2153_s14 = scalar_lea.hbm %s2538_s2, %s1454_s12  ;;  %s2141_s17 = int_to_ptr.vmem [resolvable:$true] %s248_s17 }
  0x20   : > { %s2590_s5 = scalar_select %p2145_p5, 1, 0 }
  0x21   : > { %s2155_s28 = scalar_lea.sflag [#allocation6], %s237_s9  ;;  %p2549_p7 = pneg %p2145_p5 }
  0x23   : > { %s2138_s15 = scalar_lea.hbm %s2589_s1, %s1454_s12  ;;  %s1730_s29 = scalar_lea.hbm %s2589_s1, 512 }
  0x24   : > { %s1725_s4 = scalar_lea.hbm %s2138_s15, 256  ;;  %p1731_p10 = scmp.lt.u32.totalorder %s2138_s15, %s2589_s1 }
  0x25   : > { %p1726_p6 = scmp.ne.s32.totalorder %s2138_s15, %s1725_s4  ;;  %p1732_p11 = scmp.lt.u32.totalorder %s1730_s29, %s1725_s4 }
  0x26   : > { %p1734_p13 = scmp.lt.u32.totalorder %s1725_s4, %s2138_s15 }
  0x27   : > { %p1728_p8 = pnand %p2549_p7, %p1726_p6  ;;  %p1733_p12 = por %p1732_p11, %p1731_p10 }
  0x29   : > { %p1729_p9 = pneg %p1728_p8  ;;  %p1735_p2 = por %p1734_p13, %p1733_p12 }
  0x2b   : > { %p1736_p3 = pnand %p1735_p2, %p1729_p9 }
  0x2d   : > { %1739 = shalt.err (!%p1736_p3)
}
  0x2e   : > { %s1740_s27 = scalar_lea.vmem %s2141_s17, 256  ;;  %s1999_s0 = smov [#allocation5]  }
  0x2f   : > { %p1741_p6 = scmp.ne.s32.totalorder %s2141_s17, %s1740_s27  ;;  %s1745_s9 = sshll.u32 %s1999_s0, 4  ;;  %s1746_s9 = int_to_ptr.vmem [resolvable:$false] %s1745_s9 }
  0x30   : > { %s1747_s23 = scalar_lea.vmem %s1746_s9, 512  ;;  %p1748_p0 = scmp.lt.s32.totalorder %s2141_s17, %s1746_s9 }
  0x31   : > { %p1743_p8 = pnand %p1741_p6, %p2549_p7  ;;  %p1749_p10 = scmp.lt.s32.totalorder %s1747_s23, %s1740_s27 }
  0x33   : > { %p1744_p4 = pneg %p1743_p8  ;;  %p1750_p11 = por %p1749_p10, %p1748_p0 }
  0x35   : > { %p1751_p12 = pnand %p1750_p11, %p1744_p4 }
  0x37   : > { %1754 = shalt.err (!%p1751_p12)
}
  0x38   : > { %s2550_s4 = smov 128   ;;  %s2552_s29 = smov 8  }
  0x39   : > { %1573 = dma.hbm_to_vmem [thread:$0]  (!%p2145_p5), %s2138_s15, 256, %s2141_s17, %s2155_s28, %s2550_s4, %s2550_s4, %s2552_s29  }
  0x3a   : > { %s262_s12 = scalar_lea.vmem [#allocation7], %s2132_s11  ;;  %s2190_s13 = sadd.s32 4294967295, %s1997_s6  }
  0x3b   : > { %s2187_s10 = sshll.u32 %s262_s12, 4  ;;  %2591 = sst [smem:[#allocation23_spill]] %s2190_s13  ;;  %s2303_s10 = int_to_ptr.vmem [resolvable:$true] %s2187_s10 }
  0x3c   : > { %s1412_s16 = sadd.s32 4294967294, %s1997_s6   ;;  %p2555_p0 = scmp.eq.s32.totalorder %s2190_s13, 0 }
  0x3d   : > { %p83_p4 = scmp.ne.s32.totalorder %s1961_s22, %s1957_s21  ;;  %p176_p9 = scmp.ne.s32.totalorder %s1953_s20, %s1949_s19 }
  0x3e   : > { %p177_p13 = scmp.eq.s32.totalorder %s2190_s13, 3  ;;  %p182_p2 = scmp.ne.s32.totalorder %s1949_s19, %s1945_s18 }
  0x3f   : > { %p2203_p3 = por %p83_p4, %p2555_p0  ;;  %p183_p6 = scmp.eq.s32.totalorder %s1412_s16, 3 }
  0x40   : > { %p2207_p8 = por %p177_p13, %p176_p9  ;;  %p1413_p10 = scmp.ge.s32.totalorder %s1997_s6, 1 }
  0x41   : > { %s2592_s27 = scalar_select %p2203_p3, 1, 0 }
  0x42   : > { %s2594_s11 = scalar_select %p2207_p8, 1, 0 }
  0x43   : > { %2593 = sst [smem:[#allocation24_spill]] %s2592_s27  ;;  %p2212_p11 = por %p183_p6, %p182_p2 }
  0x44   : > { %2595 = sst [smem:[#allocation25_spill]] %s2594_s11  ;;  %p190_p12 = scmp.lt.s32.totalorder %s1997_s6, 5 }
  0x45   : > { %s2596_s15 = scalar_select %p2212_p11, 1, 0 }
  0x46   : > { %p2217_p7 = pnand %p1413_p10, %p190_p12  ;;  %s2002_s17 = smov [#allocation8]  }
  0x47   : > { %2597 = sst [smem:[#allocation26_spill]] %s2596_s15  ;;  %s202_s0 = sshll.u32 %s2002_s17, 4  ;;  %s203_s0 = int_to_ptr.vmem [resolvable:$true] %s202_s0 }
  0x48   : > { %s2598_s21 = scalar_select %p2217_p7, 1, 0 }
  0x49   : > { %p1563_p4 = pneg %p2217_p7  ;;  %s2600_s3 = sld [smem:[#allocation30_spill]] }
  0x4b   : > { %p2225_p9 = pnand %p1563_p4, %p2555_p0 }
  0x4d   : > { %p1757_p2 = pneg %p2225_p9 }
  0x4f   : > { %s1755_s16 = scalar_lea.hbm %s2600_s3, 256 }
  0x50   : > { %p1756_p13 = scmp.ne.s32.totalorder %s2600_s3, %s1755_s16  ;;  %p1762_p12 = scmp.lt.u32.totalorder %s1755_s16, %s2600_s3 }
  0x52   : > { %p1758_p6 = pnand %p1757_p2, %p1756_p13 }
  0x54   : > { %p1759_p10 = pneg %p1758_p6 }
  0x56   : > { %p1764_p4 = pnand %p1762_p12, %p1759_p10 }
  0x58   : > { %1767 = shalt.err (!%p1764_p4)
}
  0x59   : > { %s1768_s15 = scalar_lea.vmem %s203_s0, 256  ;;  %p1776_p3 = scmp.lt.s32.totalorder %s203_s0, %s203_s0 }
  0x5a   : > { %p1769_p0 = scmp.ne.s32.totalorder %s203_s0, %s1768_s15  ;;  %p1777_p7 = scmp.lt.s32.totalorder %s1768_s15, %s1768_s15 }
  0x5c   : > { %p1771_p11 = pnand %p1769_p0, %p1757_p2  ;;  %p1778_p5 = por %p1777_p7, %p1776_p3 }
  0x5e   : > { %p1772_p8 = pneg %p1771_p11 }
  0x60   : > { %p1779_p1 = pnand %p1778_p5, %p1772_p8 }
  0x62   : > { %1782 = shalt.err (!%p1779_p1)
}
  0x63   : > { %s2601_s4 = smov 8   ;;  %s2602_s29 = smov 128  }
  0x64   : > { %s2603_s1 = sld [smem:[#allocation21_spill]]  ;;  %s37_s15 = sadd.s32 1, %s1993_s30 }
  0x65   : > { %1566 = dma.hbm_to_vmem [thread:$0]  (!%p2225_p9), %s2600_s3, 256, %s203_s0, [#allocation9], %s2602_s29, %s2602_s29, %s2601_s4  }
  0x66   : > { %s2604_s9 = sld [smem:[#allocation18_spill]]  ;;  %s44_s16 = sadd.s32 1, %s1977_s26 }
  0x67   : > { %p2605_p1 = scmp.ne.s32.totalorder %s2587_s8, 0  ;;  %p51_p5 = scmp.ne.s32.totalorder %s1977_s26, %s1973_s25 }
  0x68   : > { %p57_p7 = scmp.ne.s32.totalorder %s1973_s25, %s1969_s24  ;;  %p2606_p3 = scmp.eq.s32.totalorder %s1997_s6, 0 }
  0x69   : > { %s2654_s15 = smov (!%p2605_p1, %s37_s15), %s1993_s30  ;;  %p2608_p11 = scmp.eq.s32.totalorder %s2190_s13, 0 }
  0x6a   : > { %p39_p0 = scmp.ge.s32.totalorder %s2654_s15, 2  ;;  %s67_s17 = ssub.s32 %s2603_s1, %s2652_s7 }
  0x6b   : > { %p2261_p8 = por %p2606_p3, %p51_p5  ;;  %p2267_p9 = por %p2608_p11, %p57_p7 }
  0x6c   : > { %s2656_s15 = smov (%p39_p0, %s2654_s15), 0  ;;  %p68_p13 = scmp.eq.s32.totalorder %s67_s17, 0 }
  0x6d   : > { %s2609_s0 = scalar_select %p2267_p9, 1, 0 }
  0x6e   : > { %s166_s24 = sadd.s32 1, %s1953_s20  ;;  %s41_s8 = ssub.s32 %s1993_s30, %s2656_s15 }
  0x6f   : > { %2610 = sst [smem:[#allocation27_spill]] %s2609_s0  ;;  %s219_s12 = sand.u32 1, %s1977_s26  }
  0x70   : > { %p42_p2 = scmp.eq.s32.totalorder %s41_s8, 0  ;;  %s163_s1 = sor.u32 %s67_s17, %s41_s8 }
  0x71   : > { %s2611_s3 = sadd.s32 1, %s2604_s9  ;;  %p164_p6 = scmp.eq.s32.totalorder %s163_s1, 0 }
  0x72   : > { %s2658_s9 = smov (!%p68_p13, %s2604_s9), %s2611_s3  ;;  %s1416_s18 = sshll.u32 %s219_s12, 2 }
  0x73   : > { %s2283_s7 = scalar_select %p42_p2, %s1977_s26, %s44_s16  }
  0x74   : > { %s1417_s11 = sshll.u32 %s1993_s30, 6  ;;  %s2612_s13 = sld [smem:[#allocation28_spill]] }
  0x75   : > { %s2287_s19 = scalar_select %p164_p6, %s1953_s20, %s166_s24  }
  0x76   : > { %s223_s17 = scalar_lea.vmem [#allocation2], %s1416_s18  ;;  %p2613_p10 = scmp.lt.s32.totalorder %s1997_s6, 4 }
  0x77   : > { %s230_s8 = sshll.u32 %s223_s17, 4  ;;  %s220_s22 = scalar_lea.sflag [#allocation3], %s219_s12  ;;  %s2305_s8 = int_to_ptr.vmem [resolvable:$true] %s230_s8 }
  0x78   : > { %p2298_p12 = pnand %p2613_p10, %p2261_p8 }
  0x7a   : > { %s2292_s0 = scalar_lea.hbm %s2612_s13, %s1417_s11  ;;  %p1785_p1 = pneg %p2298_p12 }
  0x7b   : > { %s1783_s27 = scalar_lea.hbm %s2292_s0, 64  ;;  %s1788_s16 = scalar_lea.hbm %s2612_s13, 128 }
  0x7c   : > { %p1784_p4 = scmp.ne.s32.totalorder %s2292_s0, %s1783_s27  ;;  %p1789_p0 = scmp.lt.u32.totalorder %s2292_s0, %s2612_s13 }
  0x7d   : > { %p1790_p3 = scmp.lt.u32.totalorder %s1788_s16, %s1783_s27  ;;  %p1792_p11 = scmp.lt.u32.totalorder %s1783_s27, %s2292_s0 }
  0x7e   : > { %p1786_p5 = pnand %p1785_p1, %p1784_p4 }
  0x7f   : > { %p1791_p8 = por %p1790_p3, %p1789_p0 }
  0x80   : > { %p1787_p7 = pneg %p1786_p5 }
  0x81   : > { %p1793_p13 = por %p1792_p11, %p1791_p8 }
  0x83   : > { %p1794_p2 = pnand %p1793_p13, %p1787_p7 }
  0x85   : > { %1797 = shalt.err (!%p1794_p2)
}
  0x86   : > { %s1798_s12 = scalar_lea.vmem %s2305_s8, 64  ;;  %s2003_s1 = smov [#allocation2]  }
  0x87   : > { %p1799_p6 = scmp.ne.s32.totalorder %s2305_s8, %s1798_s12  ;;  %s1803_s17 = sshll.u32 %s2003_s1, 4  ;;  %s1804_s17 = int_to_ptr.vmem [resolvable:$false] %s1803_s17 }
  0x88   : > { %s1805_s18 = scalar_lea.vmem %s1804_s17, 128  ;;  %p1806_p5 = scmp.lt.s32.totalorder %s2305_s8, %s1804_s17 }
  0x89   : > { %p1801_p10 = pnand %p1799_p6, %p1785_p1  ;;  %p1807_p0 = scmp.lt.s32.totalorder %s1805_s18, %s1798_s12 }
  0x8b   : > { %p1802_p4 = pneg %p1801_p10  ;;  %p1808_p3 = por %p1807_p0, %p1806_p5 }
  0x8d   : > { %p1809_p8 = pnand %p1808_p3, %p1802_p4 }
  0x8f   : > { %1812 = shalt.err (!%p1809_p8)
}
  0x90   : > { %1570 = dma.hbm_to_vmem [thread:$0]  (!%p2298_p12), %s2292_s0, 64, %s2305_s8, %s220_s22  }
  0x91   : > { %s1813_s27 = scalar_lea.hbm %s2153_s14, 256  ;;  %p2615_p7 = scmp.ne.s32.totalorder %s2590_s5, 0 }
  0x92   : > { %p1814_p1 = scmp.ne.s32.totalorder %s2153_s14, %s1813_s27  ;;  %s1818_s23 = scalar_lea.hbm %s2538_s2, 512 }
  0x93   : > { %p2616_p11 = pneg %p2615_p7  ;;  %p1819_p6 = scmp.lt.u32.totalorder %s2153_s14, %s2538_s2 }
  0x94   : > { %p1820_p10 = scmp.lt.u32.totalorder %s1818_s23, %s1813_s27  ;;  %p1822_p5 = scmp.lt.u32.totalorder %s1813_s27, %s2153_s14 }
  0x95   : > { %p1816_p13 = pnand %p1814_p1, %p2616_p11 }
  0x96   : > { %p1821_p4 = por %p1820_p10, %p1819_p6 }
  0x97   : > { %p1817_p2 = pneg %p1816_p13 }
  0x98   : > { %p1823_p0 = por %p1822_p5, %p1821_p4 }
  0x9a   : > { %p1824_p3 = pnand %p1823_p0, %p1817_p2 }
  0x9c   : > { %1827 = shalt.err (!%p1824_p3)
}
  0x9d   : > { %s1828_s0 = scalar_lea.vmem %s2303_s10, 256  ;;  %p2617_p8 = pmov %p2616_p11 }
  0x9e   : > { %p1829_p12 = scmp.ne.s32.totalorder %s2303_s10, %s1828_s0  ;;  %s2004_s8 = smov [#allocation7]  }
  0x9f   : > { %s1833_s22 = sshll.u32 %s2004_s8, 4  ;;  %s1834_s22 = int_to_ptr.vmem [resolvable:$false] %s1833_s22 }
  0xa0   : > { %p1831_p1 = pnand %p1829_p12, %p2617_p8  ;;  %s1835_s12 = scalar_lea.vmem %s1834_s22, 512 }
  0xa1   : > { %p1836_p13 = scmp.lt.s32.totalorder %s2303_s10, %s1834_s22  ;;  %p1837_p6 = scmp.lt.s32.totalorder %s1835_s12, %s1828_s0 }
  0xa2   : > { %p1832_p11 = pneg %p1831_p1 }
  0xa3   : > { %p1838_p10 = por %p1837_p6, %p1836_p13 }
  0xa5   : > { %p1839_p4 = pnand %p1838_p10, %p1832_p11 }
  0xa7   : > { %1842 = shalt.err (!%p1839_p4)
}
  0xa8   : > { %1576 = dma.hbm_to_vmem [thread:$0]  (!%p2615_p7), %s2153_s14, 256, %s2303_s10, %s2155_s28, %s2602_s29, %s2602_s29, %s2601_s4  }
  0xa9   : > { %p2618_p2 = scmp.ne.s32.totalorder %s2598_s21, 0 }
  0xaa   : > { %s283_s17 = sand.u32 (!%p2618_p2), 1, %s1973_s25  }
  0xab   : > { %281 = sbr.rel (%p2618_p2) target bundleno = 1410 (0x582), region = 40  ;;  %s2362_s18 = sshll.u32 (!%p2618_p2), %s283_s17, 2 }
  0xac   : > { %s284_s27 = scalar_lea.sflag (!%p2618_p2), [#allocation3], %s283_s17  ;;  %s287_s11 = scalar_lea.vmem (!%p2618_p2), [#allocation2], %s2362_s18 }
  0xb2   : > { %1928 = dma.done.wait (%p2267_p9), %s284_s27, 64  }
  0xb3   : > { %1930 = vsyncadd (%p2267_p9), %s284_s27, 4294967232  ;;  %s2620_s5 = sld [smem:[#allocation23_spill]]  ;;  %s2621_s16 = sld [smem:[#allocation17_spill]] }
  0xb4   : > { %s2622_s23 = sld [smem:[#allocation24_spill]] }
  0xb9   : > { %s292_s28 = sand.u32 1, %s2620_s5   ;;  %s294_s14 = sand.u32 1, %s2621_s16  }
  0xba   : > { %s1426_s10 = sshll.u32 %s294_s14, 4  ;;  %s293_s21 = scalar_lea.sflag [#allocation6], %s292_s28 }
  0xbb   : > { %s296_s4 = scalar_lea.vmem [#allocation5], %s1426_s10  ;;  %p2623_p7 = scmp.ne.s32.totalorder %s2622_s23, 0 }
  0xbd   : > { %1932 = dma.done.wait (%p2623_p7), %s293_s21, 512  }
  0xbe   : > { %1934 = vsyncadd (%p2623_p7), %s293_s21, 4294966784  ;;  %s305_s29 = scalar_lea.vmem [#allocation7], %s1426_s10  ;;  %p2624_p5 = scmp.eq.s32.totalorder %s2620_s5, 0 }
  0xc0   : > { %1936 = dma.done.wait (%p2624_p5), [#allocation9], 256   ;;  %p2625_p0 = pmov %p2624_p5 }
  0xc1   : > { %v2005_v0 = vmov 0.0|0.0   ;;  %vm2006_vm0 = vmmov 0   ;;  %v2007_v1 = vmov 0.0   ;;  %v349_v2 = vld [vmem:[%s305_s29] sm:$0xff]  ;;  %v350_v3 = vld [vmem:[%s305_s29 + $0x8] sm:$0xff]  ;;  %vm354_vm1 = vcmask 130048  }
  0xc2   : > { %1938 = vsyncadd (%p2625_p0), [#allocation9], 4294967040  ;;  %1545 = vmatprep.subr.bf16.mxu1 %v2005_v0  ;;  %1542 = vmatprep.subr.bf16.mxu0 %v2005_v0  ;;  %v347_v4 = vld [vmem:[%s296_s4] sm:$0xff]  ;;  %v1546_v5 = vpack.c.bf16 %v350_v3, %v349_v2  ;;  %v348_v6 = vld [vmem:[%s296_s4 + $0x8] sm:$0xff]  ;;  %vm568_vm2 = vcmask 31744   ;;  %s2008_s24 = smov 120  }
  0xc3   : > { %1492 = vmatprep.mubr.msk.f32.mxu1 %vm2006_vm0, %v2007_v1  ;;  %1485 = vmatprep.mubr.msk.f32.mxu0 %vm2006_vm0, %v2007_v1  ;;  %v1543_v7 = vpack.c.bf16 %v348_v6, %v347_v4  ;;  %v346_v8 = vld [vmem:[%s287_s11] sm:$0xf]  ;;  %s2009_s3 = smov 124   ;;  %v351_v12 = vld [vmem:[#allocation8] sm:$0xff]  ;;  %v352_v13 = vld [vmem:[#allocation8 + $0x8] sm:$0xff]  ;;  %s2010_s0 = smov 116  }
  0xc4   : > { %1547 = vmatpush3.bf16.msra.mxu1 %v1546_v5  ;;  %v1549_v15 = vpack.c.bf16 %v352_v13, %v351_v12  ;;  %s2626_s12 = sld [smem:[#allocation31_spill]]  ;;  %vm647_vm3 = vcmask 27648   ;;  %vm662_vm4 = vcmask 1043456   ;;  %s2627_s1 = sld [smem:[#allocation16_spill]]  ;;  %vm909_vm5 = vcmask 60448  }
  0xc5   : > { %1544 = vmatpush3.bf16.msra.mxu0 %v1543_v7  ;;  %1502 = vmatprep.subr.mxu1 %v2007_v1  ;;  %s2628_s11 = sld [smem:[#allocation20_spill]]  ;;  %s2629_s5 = sld [smem:[#allocation19_spill]]  ;;  %vm1083_vm6 = vcmask 93248   ;;  %vm1257_vm7 = vcmask 126048  }
  0xc6   : > { %1548 = vmatprep.subr.bf16.mxu0 %v2005_v0  ;;  %s2011_s16 = smov 4   ;;  %s2012_s23 = smov 8  }
  0xc7   : > { %1493 = vmatmul.mubr.msk.f32.vlgmr.msra.gmra.mrb[0].mxu1 %vm354_vm1, %v346_v8  ;;  %s2013_s28 = smov 12   ;;  %s2630_s10 = sld [smem:[#allocation25_spill]] }
  0xc8   : > { %1486 = vmatmul.mubr.msk.f32.vlgmr.msra.gmra.mrb[0].mxu0 %vm354_vm1, %v346_v8  ;;  %1504 = vmatprep.mubr.msk.f32.mxu1 %vm2006_vm0, %v2007_v1 }
  0xc9   : > { %1499 = vmatprep.mubr.msk.f32.mxu0 %vm2006_vm0, %v2007_v1  ;;  %1550 = vmatpush3.bf16.msra.mxu0 %v1549_v15 }
  0xca   : > { %1507 = vmatprep.subr.mxu0 %v2007_v1  ;;  %v353_v23 = vld [vmem:[%s2626_s12] sm:$0xf]  ;;  %s343_s17 = sand.u32 1, %s2627_s1  }
  0xcb   : > { %s1429_s18 = sshll.u32 %s343_s17, 2  ;;  %s1450_s14 = sshll.u32 %s2628_s11, 1 }
  0xcc   : > { %1500 = vmatmul.mubr.msk.f32.vlgmr.msra.gmra.mrb[2].mxu0 %vm354_vm1, %v346_v8  ;;  %s345_s27 = scalar_lea.vmem [#allocation10], %s1429_s18  ;;  %s1271_s21 = sadd.s32 %s2629_s5, %s1450_s14 }
  0xcd   : > { %1509 = vmatprep.mubr.msk.f32.mxu0 %vm2006_vm0, %v2007_v1  ;;  %s1451_s4 = sshll.u32 %s1271_s21, 6  ;;  %s1275_s29 = sshll.u32 %s345_s27, 4  ;;  %s2459_s29 = int_to_ptr.vmem [resolvable:$true] %s1275_s29 }
  0xce   : > { %s1260_s22 = scalar_lea.sflag [#allocation4], %s343_s17  ;;  %s1843_s12 = scalar_lea.vmem %s2459_s29, 64 }
  0xcf   : > { %p1844_p9 = scmp.ne.s32.totalorder %s2459_s29, %s1843_s12  ;;  %p2632_p3 = scmp.ne.s32.totalorder %s2630_s10, 0 }
  0xd0   : > { %s2014_s18 = smov [#allocation10]  }
  0xd1   : > { %p1845_p12 = pnand %p1844_p9, %p2632_p3  ;;  %s1847_s11 = sshll.u32 %s2014_s18, 4  ;;  %s1848_s11 = int_to_ptr.vmem [resolvable:$false] %s1847_s11 }
  0xd2   : > { %s1849_s5 = scalar_lea.vmem %s1848_s11, 128  ;;  %p1850_p1 = scmp.lt.s32.totalorder %s2459_s29, %s1848_s11 }
  0xd3   : > { %p1846_p8 = pneg %p1845_p12  ;;  %p1851_p11 = scmp.lt.s32.totalorder %s1849_s5, %s1843_s12 }
  0xd5   : > { %p1852_p13 = por %p1851_p11, %p1850_p1 }
  0xd7   : > { %p1853_p6 = pnand %p1852_p13, %p1846_p8 }
 0x19a   : > { %v494_v9 = vpop.f32.mrb[0].mxu1 }
 0x19b   : > { %913 = vrot.lane.b32.xlu1 %v494_v9, %s2008_s24  ;;  %739 = vrot.lane.b32.xlu0 %v494_v9, %s2009_s3  ;;  %v1494_v10 = vpop.f32.mrb[1].mxu1  ;;  %v424_v11 = vpop.f32.mrb[0].mxu0 }
 0x19c   : > { %1503 = vmatpush3.xpose.msk.msra.mxu1 %vm568_vm2, %v494_v9  ;;  %v1487_v14 = vpop.f32.mrb[1].mxu0 }
 0x19d   : > { %1512 = vmatprep.subr.mxu1 %v2007_v1 }
 0x19f   : > { %1505 = vmatmul.mubr.msk.f32.vlgmr.msra.gmra.mrb[2].mxu1 %vm568_vm2, %v424_v11  ;;  %911 = vrot.lane.b32.xlu1 %v424_v11, %s2008_s24  ;;  %v564_v26 = vpop.f32.mrb[2].mxu0 }
 0x1a0   : > { %737 = vrot.lane.b32.xlu0 %v424_v11, %s2009_s3  ;;  %1514 = vmatprep.mubr.msk.f32.mxu1 %vm2006_vm0, %v2007_v1  ;;  %v1501_v28 = vpop.f32.mrb[3].mxu0 }
 0x1a1   : > { %1508 = vmatpush3.msk.msra.mxu0 %vm662_vm4, %v564_v26 }
 0x1a2   : > { %1517 = vmatprep.subr.mxu0 %v2007_v1 }
 0x1a3   : > { %1085 = vrot.lane.b32.xlu1 %v424_v11, %s2010_s0 }
 0x1a4   : > { %1087 = vrot.lane.b32.xlu0 %v494_v9, %s2010_s0 }
 0x20d   : > { %v740_v16 = vpop.permute.xlu0 %739  ;;  %v914_v17 = vpop.permute.xlu1 %913 }
 0x20e   : > { %1513 = vmatpush3.xpose.msk.msra.mxu1 %vm568_vm2, %v740_v16 }
 0x20f   : > { %1522 = vmatprep.subr.mxu1 %v2007_v1 }
 0x211   : > { %v912_v19 = vpop.permute.xlu1 %911 }
 0x212   : > { %v738_v18 = vpop.permute.xlu0 %737 }
 0x213   : > { %1515 = vmatmul.mubr.msk.f32.vlgmr.msra.gmra.mrb[4].mxu1 %vm568_vm2, %v738_v18 }
 0x214   : > { %1523 = vmatpush3.xpose.msk.msra.mxu1 %vm568_vm2, %v914_v17  ;;  %1524 = vmatprep.mubr.msk.f32.mxu1 %vm2006_vm0, %v2007_v1 }
 0x215   : > { %1532 = vmatprep.subr.mxu1 %v2007_v1  ;;  %v1086_v21 = vpop.permute.xlu1 %1085 }
 0x216   : > { %v1088_v20 = vpop.permute.xlu0 %1087 }
 0x217   : > { %1525 = vmatmul.mubr.msk.f32.vlgmr.msra.gmra.mrb[6].mxu1 %vm568_vm2, %v912_v19 }
 0x218   : > { %1533 = vmatpush3.xpose.msk.msra.mxu1 %vm568_vm2, %v1088_v20  ;;  %1534 = vmatprep.mubr.msk.f32.mxu1 %vm2006_vm0, %v2007_v1 }
 0x21b   : > { %1535 = vmatmul.mubr.msk.f32.vlgmr.msra.gmra.mrb[8].mxu1 %vm568_vm2, %v1086_v21 }
 0x272   : > { %v641_v22 = vpop.f32.mrb[2].mxu1 }
 0x273   : > { %v645_v24 = vmul.f32 0.5, %v641_v22  ;;  %v1506_v25 = vpop.f32.mrb[3].mxu1 }
 0x275   : > { %v646_v27 = vadd.f32 %v645_v24, %v353_v23 }
 0x277   : > { %v648_v29 = vsel %vm647_vm3, %v646_v27, -inf }
 0x278   : > { %649 = vmax.xlane.f32.xlu0 %v648_v29 }
 0x2e6   : > { %v811_v30 = vpop.f32.mrb[4].mxu1 }
 0x2e7   : > { %v815_v31 = vmul.f32 0.5, %v811_v30  ;;  %v1516_v32 = vpop.f32.mrb[5].mxu1 }
 0x2e9   : > { %v816_v33 = vadd.f32 %v815_v31, %v353_v23 }
 0x2ea   : > { %v985_v34 = vpop.f32.mrb[6].mxu1 }
 0x2eb   : > { %v989_v35 = vmul.f32 0.5, %v985_v34  ;;  %v1526_v36 = vpop.f32.mrb[7].mxu1  ;;  %v817_v37 = vsel %vm647_vm3, %v816_v33, -inf }
 0x2ec   : > { %818 = vmax.xlane.f32.xlu1 %v817_v37 }
 0x2ed   : > { %v990_v38 = vadd.f32 %v989_v35, %v353_v23 }
 0x2ee   : > { %v1159_v39 = vpop.f32.mrb[8].mxu1 }
 0x2ef   : > { %v1163_v40 = vmul.f32 0.5, %v1159_v39  ;;  %v1536_v41 = vpop.f32.mrb[9].mxu1  ;;  %v991_v42 = vsel %vm647_vm3, %v990_v38, -inf }
 0x2f0   : > { %992 = vmax.xlane.f32.xlu0 %v991_v42 }
 0x2f1   : > { %v1164_v43 = vadd.f32 %v1163_v40, %v353_v23 }
 0x2f3   : > { %v1165_v44 = vsel %vm647_vm3, %v1164_v43, -inf }
 0x2f4   : > { %1166 = vmax.xlane.f32.xlu0 %v1165_v44 }
 0x2fd   : > { %828 = vrot.lane.b32.xlu1 %v564_v26, %s2009_s3 }
 0x305   : > { %v650_v45 = vpop.xlane.xlu0 %649 }
 0x306   : > { %v651_v46 = vsub.f32 %v646_v27, %v650_v45 }
 0x308   : > { %v652_v47 = vmul.f32 1.442695, %v651_v46 }
 0x30a   : > { %1709 = vpow2.f32 %v652_v47 }
 0x314   : > { %v1710_v48 = vpop.eup %1709 }
 0x315   : > { %v654_v49 = vsel %vm647_vm3, %v1710_v48, 0.0 }
 0x321   : > { %655 = vadd.xlane.f32.xlu1 %v654_v49 }
 0x379   : > { %v819_v50 = vpop.xlane.xlu1 %818 }
 0x37a   : > { %v820_v51 = vsub.f32 %v816_v33, %v819_v50 }
 0x37c   : > { %v821_v52 = vmul.f32 1.442695, %v820_v51 }
 0x37d   : > { %v993_v53 = vpop.xlane.xlu0 %992  ;;  %v829_v2 = vpop.permute.xlu1 %828 }
 0x37e   : > { %1711 = vpow2.f32 %v821_v52  ;;  %v994_v54 = vsub.f32 %v990_v38, %v993_v53 }
 0x380   : > { %v995_v55 = vmul.f32 1.442695, %v994_v54 }
 0x381   : > { %v1167_v56 = vpop.xlane.xlu0 %1166 }
 0x382   : > { %1713 = vpow2.f32 %v995_v55  ;;  %v1168_v57 = vsub.f32 %v1164_v43, %v1167_v56 }
 0x384   : > { %v1169_v58 = vmul.f32 1.442695, %v1168_v57 }
 0x386   : > { %1715 = vpow2.f32 %v1169_v58 }
 0x388   : > { %v1712_v59 = vpop.eup %1711 }
 0x389   : > { %v823_v60 = vsel %vm647_vm3, %v1712_v59, 0.0 }
 0x38a   : > { %824 = vadd.xlane.f32.xlu0 %v823_v60 }
 0x38c   : > { %v1714_v61 = vpop.eup %1713 }
 0x38d   : > { %v997_v62 = vsel %vm647_vm3, %v1714_v61, 0.0 }
 0x38e   : > { %998 = vadd.xlane.f32.xlu1 %v997_v62 }
 0x390   : > { %v1716_v63 = vpop.eup %1715 }
 0x391   : > { %v1171_v0 = vsel %vm647_vm3, %v1716_v63, 0.0 }
 0x392   : > { %1172 = vadd.xlane.f32.xlu0 %v1171_v0 }
 0x39f   : > { %1176 = vrot.lane.b32.xlu1 %v564_v26, %s2010_s0  ;;  %s2631_s0 = sld [smem:[#allocation32_spill]] }
 0x3a5   : > { %s2457_s8 = scalar_lea.hbm %s2631_s0, %s1451_s4 }
 0x3a8   : > { %1002 = vrot.lane.b32.xlu0 %v564_v26, %s2008_s24 }
 0x3ae   : > { %v656_v3 = vpop.xlane.xlu1 %655 }
 0x3af   : > { %1717 = vrcp.f32 %v656_v3 }
 0x3b9   : > { %v1718_v4 = vpop.eup %1717 }
 0x3ba   : > { %v658_v5 = vmul.f32 %v1718_v4, %v1710_v48 }
 0x3bc   : > { %1510 = vmatmul.mubr.msk.f32.vlgmr.msra.gmra.mrb[4].mxu0 %vm568_vm2, %v658_v5 }
 0x3bd   : > { %1518 = vmatpush3.msk.msra.mxu0 %vm662_vm4, %v829_v2  ;;  %1519 = vmatprep.mubr.msk.f32.mxu0 %vm2006_vm0, %v2007_v1 }
 0x3be   : > { %1527 = vmatprep.subr.mxu0 %v2007_v1 }
 0x417   : > { %v825_v6 = vpop.xlane.xlu0 %824 }
 0x418   : > { %1719 = vrcp.f32 %v825_v6 }
 0x41b   : > { %v999_v7 = vpop.xlane.xlu1 %998 }
 0x41c   : > { %1721 = vrcp.f32 %v999_v7 }
 0x41f   : > { %v1173_v8 = vpop.xlane.xlu0 %1172  ;;  %v1177_v14 = vpop.permute.xlu1 %1176 }
 0x420   : > { %1723 = vrcp.f32 %v1173_v8 }
 0x422   : > { %v1720_v9 = vpop.eup %1719 }
 0x423   : > { %v827_v10 = vmul.f32 %v1720_v9, %v1712_v59  ;;  %v1003_v11 = vpop.permute.xlu0 %1002 }
 0x425   : > { %1520 = vmatmul.mubr.msk.f32.vlgmr.msra.gmra.mrb[6].mxu0 %vm568_vm2, %v827_v10 }
 0x426   : > { %v1722_v12 = vpop.eup %1721  ;;  %1528 = vmatpush3.msk.msra.mxu0 %vm662_vm4, %v1003_v11  ;;  %1529 = vmatprep.mubr.msk.f32.mxu0 %vm2006_vm0, %v2007_v1 }
 0x427   : > { %v1001_v13 = vmul.f32 %v1722_v12, %v1714_v61  ;;  %1537 = vmatprep.subr.mxu0 %v2007_v1 }
 0x429   : > { %1530 = vmatmul.mubr.msk.f32.vlgmr.msra.gmra.mrb[8].mxu0 %vm568_vm2, %v1001_v13 }
 0x42a   : > { %v1724_v15 = vpop.eup %1723  ;;  %1538 = vmatpush3.msk.msra.mxu0 %vm662_vm4, %v1177_v14  ;;  %1539 = vmatprep.mubr.msk.f32.mxu0 %vm2006_vm0, %v2007_v1 }
 0x42b   : > { %v1175_v16 = vmul.f32 %v1724_v15, %v1716_v63 }
 0x42d   : > { %1540 = vmatmul.mubr.msk.f32.vlgmr.msra.gmra.mrb[10].mxu0 %vm568_vm2, %v1175_v16 }
 0x48f   : > { %v732_v17 = vpop.f32.mrb[4].mxu0 }
 0x490   : > { %736 = vst.msk [vmem:[%s345_s27] sm:$0xf] %vm647_vm3, %v732_v17  ;;  %v1511_v18 = vpop.f32.mrb[5].mxu0 }
 0x4f8   : > { %v901_v19 = vpop.f32.mrb[6].mxu0 }
 0x4f9   : > { %906 = vrot.lane.b32.xlu1 %v901_v19, %s2011_s16  ;;  %v1521_v20 = vpop.f32.mrb[7].mxu0 }
 0x4fc   : > { %v1075_v21 = vpop.f32.mrb[8].mxu0 }
 0x4fd   : > { %1080 = vrot.lane.b32.xlu0 %v1075_v21, %s2012_s23  ;;  %v1531_v1 = vpop.f32.mrb[9].mxu0 }
 0x500   : > { %v1249_v22 = vpop.f32.mrb[10].mxu0 }
 0x501   : > { %1254 = vrot.lane.b32.xlu1 %v1249_v22, %s2013_s28  ;;  %v1541_v23 = vpop.f32.mrb[11].mxu0 }
 0x56b   : > { %v907_v24 = vpop.permute.xlu1 %906 }
 0x56c   : > { %910 = vst.msk [vmem:[%s345_s27] sm:$0xf] %vm909_vm5, %v907_v24 }
 0x56f   : > { %v1081_v25 = vpop.permute.xlu0 %1080 }
 0x570   : > { %1084 = vst.msk [vmem:[%s345_s27] sm:$0xf] %vm1083_vm6, %v1081_v25 }
 0x573   : > { %v1255_v26 = vpop.permute.xlu1 %1254 }
 0x574   : > { %1258 = vst.msk [vmem:[%s345_s27] sm:$0xf] %vm1257_vm7, %v1255_v26 }
 0x575   : > { %1856 = shalt.err (!%p1853_p6)
}
 0x576   : > { %s1857_s1 = scalar_lea.hbm %s2457_s8, 64  ;;  %s1861_s16 = scalar_lea.hbm %s2631_s0, 256 }
 0x577   : > { %p1858_p10 = scmp.ne.s32.totalorder %s2457_s8, %s1857_s1  ;;  %p1862_p7 = scmp.lt.u32.totalorder %s2457_s8, %s2631_s0 }
 0x578   : > { %p1863_p5 = scmp.lt.u32.totalorder %s1861_s16, %s1857_s1  ;;  %p1865_p9 = scmp.lt.u32.totalorder %s1857_s1, %s2457_s8 }
 0x579   : > { %p1859_p4 = pnand %p1858_p10, %p2632_p3 }
 0x57a   : > { %p1864_p0 = por %p1863_p5, %p1862_p7 }
 0x57b   : > { %p1860_p2 = pneg %p1859_p4 }
 0x57c   : > { %p1866_p12 = por %p1865_p9, %p1864_p0 }
 0x57e   : > { %p1867_p8 = pnand %p1866_p12, %p1860_p2 }
 0x580   : > { %1870 = shalt.err (!%p1867_p8)
}
 0x581   : > { %1561 = dma.vmem_to_hbm [thread:$0]  (%p2632_p3), %s2459_s29, 64, %s2457_s8, %s1260_s22  }
 0x582 PF: > { %s2633_s14 = sld [smem:[#allocation15_spill]]  ;;  %s2634_s21 = sld [smem:[#allocation26_spill]] }
 0x583   : > { %p1584_p1 = scmp.ge.s32.totalorder %s1997_s6, 2 }
 0x588   : > { %s1287_s4 = sand.u32 1, %s2633_s14   ;;  %p2635_p11 = scmp.ne.s32.totalorder %s2634_s21, 0 }
 0x589   : > { %s1288_s24 = scalar_lea.sflag [#allocation4], %s1287_s4 }
 0x58a   : > { %p1578_p13 = pnand %p1584_p1, %p2635_p11 }
 0x58c   : > { %1940 = dma.done.wait (!%p1578_p13), %s1288_s24, 64  }
 0x58d   : > { %1942 = vsyncadd (!%p1578_p13), %s1288_s24, 4294967232  ;;  %s25_s6 = sadd.s32 1, %s1997_s6   ;;  %s2637_s18 = sld [smem:[#allocation16_spill]] }
 0x58e   : > { %p2489_p6 = scmp.ge.s32.totalorder %s25_s6, 6   ;;  %s2638_s10 = smov %s2287_s19 }
 0x58f   : > { %s2639_s21 = sld [smem:[#allocation17_spill]]  ;;  %s2640_s22 = sld [smem:[#allocation18_spill]] }
 0x590   : > { %s2641_s27 = sld [smem:[#allocation21_spill]]  ;;  %s2642_s29 = sld [smem:[#allocation22_spill]] }
 0x591   : > { %s2643_s19 = smov %s1953_s20  ;;  %s2644_s20 = smov %s2638_s10 }
 0x592   : > { %s2645_s23 = smov %s2658_s9  ;;  %s2646_s24 = smov %s1973_s25 }
 0x593   : > { %s2647_s25 = smov %s1977_s26  ;;  %s2648_s26 = smov %s2283_s7 }
 0x594   : > { %s2649_s28 = smov %s1993_s30  ;;  %s2650_s30 = smov %s2656_s15 }
 0x595   :  { %24 = sbr.rel (!%p2489_p6) target bundleno = 19 (0x13), region = 113 }
 0x59c   :  { %1293 = vsyncpa [#allocation3], 1 }
 0x59d   :  { %1295 = vsyncpa [#allocation3 + $0x1], 1 }
 0x59e   :  { %1296 = vsyncpa [#allocation6], 1 }
 0x59f   :  { %1298 = vsyncpa [#allocation6 + $0x1], 1 }
 0x5a0   :  { %1299 = vsyncpa [#allocation9], 1 }
 0x5a1   :  { %1300 = vsyncpa [#allocation4], 1 }
 0x5a2   :  { %1302 = vsyncpa [#allocation4 + $0x1], 1 }

</bundles_post_ra>
